<compile_context>
chip_gen: v7x
topology: tpu7x:2x2x1
jax: 0.10.0
libtpu: 0.0.40
codegen_flags: <defaults>
</compile_context>

<pallas_src>
import functools

import jax
import jax.numpy as jnp
from jax import lax
from jax.experimental import pallas as pl
from jax.experimental.pallas import tpu as pltpu


def _round_up(v, m):
    return -(-v // m) * m


def _vmem_capacity_bytes():
    """Physical VMEM of the local TPU generation; conservative 64 MiB fallback."""
    try:
        cap = int(pltpu.get_tpu_info().vmem_capacity_bytes)
        if cap > 0:
            return cap
    except Exception:
        pass
    return 64 * 1024 * 1024


def _softmax_pv_tile(k_j, q_op, x_j, v_all, o_ref, *, c, c8, n_real, exp_dtype):
    """Shared per-key-tile body: scores -> softmax over queries -> PV -> residual.

    k_j   : (dq, tj)       key-side operand for this tile (already projected)
    q_op  : (dq, n_pad)    query-side operand (projected Q, or x itself when re-associated)
    x_j   : (c, tj)        residual slice of x
    v_all : (c8+8, n_pad)  [gamma*V ; zero pad ; ones] -- ones rows fuse the denominator
    """
    # Scores already transposed: s_t[j, i] = <k_j, q_i>.  torch.softmax(dim=1)
    # normalizes over queries i, which is the LAST (lane) axis here.
    s_t = lax.dot_general(k_j, q_op, (((0,), (0,)), ((), ())),
                          preferred_element_type=jnp.float32)            # (tj, n_pad)
    n_pad = s_t.shape[-1]
    if n_real != n_pad:
        # Padded query columns must not contribute to the softmax.
        qi = lax.broadcasted_iota(jnp.int32, s_t.shape, 1)
        s_t = jnp.where(qi < n_real, s_t, jnp.float32(-1e30))
    m = jnp.max(s_t, axis=-1, keepdims=True)                             # (tj, 1)
    e = jnp.exp((s_t - m).astype(exp_dtype)).astype(v_all.dtype)         # (tj, n_pad)

    # One MXU pass yields gamma*V @ e^T (rows 0:c) AND the per-key exp-sums
    # (rows c8:), because v_all's tail rows are all-ones.
    pv = lax.dot_general(v_all, e, (((1,), (1,)), ((), ())),
                         preferred_element_type=jnp.float32)             # (c8+8, tj)
    denom = pv[c8:c8 + 1, :]                                             # (1, tj)
    inv = pl.reciprocal(denom, approx=True)
    inv = inv * (2.0 - denom * inv)   # one Newton step -> ~f32 accuracy, EUP/VPU only

    # gamma is folded into Wv host-side, so this is gamma*attention + x.
    o_ref[...] = (pv[0:c, :] * inv + x_j.astype(jnp.float32)).astype(o_ref.dtype)


def _sa2d_kernel_reassoc(xf_ref, wa_ref, wv_ref, o_ref, v_sc, *,
                         c, c8, n_real, key_block, exp_dtype):
    """Re-associated path: s = x^T (Wq^T Wk / scale) x, contraction width = c."""
    jk = pl.program_id(1)
    n_pad = xf_ref.shape[1]

    @pl.when(jk == 0)  # once per batch element
    def _():
        gv = jnp.dot(wv_ref[...], xf_ref[...],
                     preferred_element_type=jnp.float32)                 # (c8, n_pad)
        v_sc[0:c8, :] = gv.astype(v_sc.dtype)
        v_sc[c8:c8 + 8, :] = jnp.ones((8, n_pad), v_sc.dtype)            # fused-denominator rows

    x_j = xf_ref[:, pl.ds(pl.multiple_of(jk * key_block, key_block), key_block)]   # (c, tj)
    k_j = jnp.dot(wa_ref[...], x_j,
                  preferred_element_type=jnp.float32).astype(xf_ref.dtype)         # (c, tj)
    _softmax_pv_tile(k_j, xf_ref[...], x_j, v_sc[...], o_ref,
                     c=c, c8=c8, n_real=n_real, exp_dtype=exp_dtype)


def _sa2d_kernel_proj(xf_ref, wq_ref, wk_ref, wv_ref, o_ref, v_sc, q_sc, *,
                      c, c8, n_real, key_block, exp_dtype):
    """Projected-Q path: used when c exceeds the MXU contraction depth."""
    jk = pl.program_id(1)
    n_pad = xf_ref.shape[1]

    @pl.when(jk == 0)  # once per batch element
    def _():
        x = xf_ref[...]
        q_sc[...] = jnp.dot(wq_ref[...], x,
                            preferred_element_type=jnp.float32).astype(q_sc.dtype)
        gv = jnp.dot(wv_ref[...], x, preferred_element_type=jnp.float32)
        v_sc[0:c8, :] = gv.astype(v_sc.dtype)
        v_sc[c8:c8 + 8, :] = jnp.ones((8, n_pad), v_sc.dtype)

    x_j = xf_ref[:, pl.ds(pl.multiple_of(jk * key_block, key_block), key_block)]   # (c, tj)
    k_j = jnp.dot(wk_ref[...], x_j,
                  preferred_element_type=jnp.float32).astype(q_sc.dtype)           # (dqk, tj)
    _softmax_pv_tile(k_j, q_sc[...], x_j, v_sc[...], o_ref,
                     c=c, c8=c8, n_real=n_real, exp_dtype=exp_dtype)


def self_attention_2d(x, wq, wk, wv, gamma, scale=None, *, key_block=None, reassoc=None):
    """SAGAN self-attention with residual skip.

    x: (b, c, h, w).  wq/wk: (dqk, c), wv: (c, c) -- Conv1d(k=1, bias=False)
    weights squeezed to (out_channels, in_channels).  gamma: scalar.
    scale: None, or a float the scores are divided by.
    """
    b, c, h, w = x.shape
    n = h * w
    dqk = wq.shape[0]
    dtype = x.dtype
    isz = jnp.dtype(dtype).itemsize
    c8 = _round_up(c, 8)
    n_pad = _round_up(n, 128)                       # lane-dense spatial axis
    exp_dtype = jnp.bfloat16 if dtype == jnp.bfloat16 else jnp.float32

    # (b, c, h, w) -> (b, c, n_pad): free reshape + zero-pad of the spatial axis if needed.
    x_cn = x.reshape(b, c, n)
    if n_pad != n:
        x_cn = jnp.pad(x_cn, ((0, 0), (0, 0), (0, n_pad - n)))

    # Host-side weight prep (free): fold gamma into Wv, 1/scale into the score weights.
    gamma_f = jnp.asarray(gamma, jnp.float32).reshape(())
    inv_scale = jnp.float32(1.0) if scale is None else jnp.float32(1.0) / jnp.asarray(scale, jnp.float32)

    wv_aug = wv.astype(jnp.float32) * gamma_f                              # (c, c)
    if c8 != c:
        wv_aug = jnp.pad(wv_aug, ((0, c8 - c), (0, 0)))                    # pad to (c8, c)
    wv_aug = wv_aug.astype(dtype)

    if reassoc is None:
        # Re-associate when the contraction fits the MXU depth on every generation
        # (128 on v5e; 256 on v6e/v7x -- gate conservatively at 128) and dqk < c.
        reassoc = (dqk < c) and (c <= 128)

    if reassoc:
        w_score = ((wq.astype(jnp.float32).T @ wk.astype(jnp.float32))
                   * inv_scale).astype(dtype)                              # A = Wq^T Wk / scale, (c, c)
    else:
        wq_eff = (wq.astype(jnp.float32) * inv_scale).astype(dtype)        # (dqk, c)
        wk_eff = wk.astype(dtype)

    # ---- generation-aware VMEM budget & key-tile size ------------------------
    vmem_cap = _vmem_capacity_bytes()
    vmem_budget = int(0.85 * vmem_cap)        # headroom for compiler-internal scratch/spill

    def _estimate(kb):
        fixed = 2 * c * n_pad * isz                          # x block (double-buffered)
        fixed += (c8 + 8) * n_pad * isz                      # gamma*V (+ones) scratch
        if not reassoc:
            fixed += max(dqk, 8) * n_pad * isz               # Q scratch
        w_elems = (c * c if reassoc else 2 * dqk * c) + c8 * c
        fixed += 2 * w_elems * isz                           # weight blocks
        per = 2 * c * kb * isz                               # output block (double-buffered)
        per += kb * n_pad * (8 + isz)                        # score slab + f32 temp + exp slab
        per += (c8 + 8) * kb * 4 + c8 * kb * isz             # PV result + projected keys
        return fixed + per

    if key_block is None:
        if c % 8 != 0:
            key_block = n_pad                 # keep output block == full array dims
        else:
            cands = sorted({kb for kb in (n_pad, 4096, 2048, 1024, 512, 256, 128)
                            if kb <= n_pad and n_pad % kb == 0}, reverse=True)
            key_block = next((kb for kb in cands if _estimate(kb) <= vmem_budget), cands[-1])
    assert n_pad % key_block == 0, "key_block must divide the padded spatial size"
    n_kb = n_pad // key_block

    vmem_limit = int(min(vmem_budget, max(2 * _estimate(key_block), 24 * 1024 * 1024)))

    # ---- pallas_call ----------------------------------------------------------
    x_spec = pl.BlockSpec((None, c, n_pad), lambda ib, jk: (ib, 0, 0))
    out_spec = pl.BlockSpec((None, c, key_block), lambda ib, jk: (ib, 0, jk))

    def w_spec(shape):
        return pl.BlockSpec(shape, lambda ib, jk: (0, 0))

    common = dict(c=c, c8=c8, n_real=n, key_block=key_block, exp_dtype=exp_dtype)
    if reassoc:
        kernel = functools.partial(_sa2d_kernel_reassoc, **common)
        in_specs = [x_spec, w_spec((c, c)), w_spec((c8, c))]
        scratch = [pltpu.VMEM((c8 + 8, n_pad), dtype)]
        operands = (x_cn, w_score, wv_aug)
    else:
        kernel = functools.partial(_sa2d_kernel_proj, **common)
        in_specs = [x_spec, w_spec((dqk, c)), w_spec((dqk, c)), w_spec((c8, c))]
        scratch = [pltpu.VMEM((c8 + 8, n_pad), dtype), pltpu.VMEM((dqk, n_pad), dtype)]
        operands = (x_cn, wq_eff, wk_eff, wv_aug)

    out_cn = pl.pallas_call(
        kernel,
        out_shape=jax.ShapeDtypeStruct((b, c, n_pad), dtype),
        grid_spec=pltpu.PrefetchScalarGridSpec(
            num_scalar_prefetch=0,
            grid=(b, n_kb),
            in_specs=in_specs,
            out_specs=out_spec,
            scratch_shapes=scratch,
        ),
        compiler_params=pltpu.CompilerParams(
            dimension_semantics=("parallel", "arbitrary"),
            vmem_limit_bytes=vmem_limit,
        ),
    )(*operands)

    if n_pad != n:
        out_cn = out_cn[:, :, :n]
    return out_cn.reshape(b, c, h, w)


def self_attention_2d_ref(x, wq, wk, wv, gamma, scale=None):
    """Pure-JAX reference mirroring the PyTorch forward exactly."""
    b, c, h, w = x.shape
    n = h * w
    xf = x.reshape(b, c, n).astype(jnp.float32)
    q = jnp.einsum("dc,bcn->bdn", wq.astype(jnp.float32), xf)   # (b, dqk, n)
    k = jnp.einsum("dc,bcn->bdn", wk.astype(jnp.float32), xf)   # (b, dqk, n)
    v = jnp.einsum("ec,bcn->ben", wv.astype(jnp.float32), xf)   # (b, c, n)
    s = jnp.einsum("bdi,bdj->bij", q, k)                        # (b, n, n)
    if scale is not None:
        s = s / jnp.asarray(scale, jnp.float32)
    aw = jax.nn.softmax(s, axis=1)                              # torch.softmax(dim=1): over queries
    attn = jnp.einsum("bci,bij->bcj", v, aw)                    # (b, c, n)
    out = jnp.asarray(gamma, jnp.float32) * attn + xf
    return out.reshape(b, c, h, w).astype(x.dtype)


if __name__ == "__main__":
    # Small shapes consistent with the module: num_channels=32 -> dqk = 32 // 8 = 4.
    B, C, H, W = 2, 32, 8, 8
    DQK = C // 8

    key = jax.random.PRNGKey(0)
    kx, kq, kk, kv = jax.random.split(key, 4)

    x = jax.random.normal(kx, (B, C, H, W), dtype=jnp.float32)
    # Conv1d(kernel_size=1, bias=False) weights squeezed to (out_channels, in_channels).
    wq = jax.random.normal(kq, (DQK, C), dtype=jnp.float32) * 0.1
    wk = jax.random.normal(kk, (DQK, C), dtype=jnp.float32) * 0.1
    wv = jax.random.normal(kv, (C, C), dtype=jnp.float32) * 0.1
    # gamma init is 0.0 in the module (attention path disabled); use a nonzero
    # value so the attention path is actually exercised by the check.
    gamma = jnp.float32(0.5)

    # f32: both score paths (re-associated + projected-Q), with and without scaling.
    for scale in (None, float(DQK) ** 0.5):
        ref = self_attention_2d_ref(x, wq, wk, wv, gamma, scale=scale)
        for ra in (None, False):   # None -> heuristic (re-assoc here); False -> projected-Q path
            out = jax.block_until_ready(
                self_attention_2d(x, wq, wk, wv, gamma, scale=scale, reassoc=ra))
            assert out.shape == (B, C, H, W)
            assert jnp.allclose(out, ref, rtol=1e-4, atol=1e-4), \
                f"mismatch vs reference (scale={scale}, reassoc={ra})"

    # bf16 path (bf16 exp + bf16 MXU operands, f32 accumulation), looser tolerance.
    xb, wqb, wkb, wvb = (t.astype(jnp.bfloat16) for t in (x, wq, wk, wv))
    out_b = jax.block_until_ready(self_attention_2d(xb, wqb, wkb, wvb, gamma, scale=None))
    ref_b = self_attention_2d_ref(xb, wqb, wkb, wvb, gamma, scale=None)
    assert out_b.shape == (B, C, H, W)
    assert jnp.allclose(out_b.astype(jnp.float32), ref_b.astype(jnp.float32),
                        rtol=5e-2, atol=6e-2), "mismatch vs reference (bf16)"

    print("KERNEL_OK")
</pallas_src>

<mosaic_0001>
module attributes {stable_mosaic.version = 11 : i64} {
  func.func @_sa2d_kernel_reassoc(%arg0: i32, %arg1: i32, %arg2: memref<1x32x128xf32, #tpu.memory_space<vmem>>, %arg3: memref<32x32xf32, #tpu.memory_space<vmem>>, %arg4: memref<32x32xf32, #tpu.memory_space<vmem>>, %arg5: memref<1x32x128xf32, #tpu.memory_space<vmem>>, %arg6: memref<40x128xf32, #tpu.memory_space<vmem>>) attributes {dimension_semantics = [#tpu.dimension_semantics<parallel>, #tpu.dimension_semantics<arbitrary>], iteration_bounds = array<i64: 2, 1>, scalar_prefetch = 0 : i64, scratch_operands = 1 : i64, tpu.core_type = #tpu.core_type<tc>, window_params = [{transform_indices = @transform_0, window_bounds = array<i64: 1, 32, 128>}, {pipeline_mode = #tpu.pipeline_mode<synchronous>, transform_indices = @transform_1, window_bounds = array<i64: 32, 32>}, {pipeline_mode = #tpu.pipeline_mode<synchronous>, transform_indices = @transform_2, window_bounds = array<i64: 32, 32>}, {transform_indices = @transform_3, window_bounds = array<i64: 1, 32, 128>}]} {
    %c0_i32 = arith.constant 0 : i32
    %0 = arith.cmpi eq, %arg1, %c0_i32 : i32
    %1 = arith.extui %0 : i1 to i32
    %c0_i32_0 = arith.constant 0 : i32
    %2 = arith.cmpi ne, %1, %c0_i32_0 : i32
    scf.if %2 {
      %c0_17 = arith.constant 0 : index
      %c0_18 = arith.constant 0 : index
      %38 = vector.load %arg4[%c0_17, %c0_18] : memref<32x32xf32, #tpu.memory_space<vmem>>, vector<32x32xf32>
      %c0_19 = arith.constant 0 : index
      %c0_20 = arith.constant 0 : index
      %c0_21 = arith.constant 0 : index
      %39 = vector.load %arg2[%c0_19, %c0_20, %c0_21] : memref<1x32x128xf32, #tpu.memory_space<vmem>>, vector<1x32x128xf32>
      %40 = vector.shape_cast %39 : vector<1x32x128xf32> to vector<32x128xf32>
      %cst_22 = arith.constant dense<0.000000e+00> : vector<32x128xf32>
      %41 = tpu.matmul %38, %40, %cst_22 {dimension_numbers = #tpu.dot_dimension_numbers<[1], [0], [0], [1], [0, 0, 1, 1], [], []>} : vector<32x32xf32>, vector<32x128xf32>, vector<32x128xf32> -> vector<32x128xf32>
      %c0_23 = arith.constant 0 : index
      %c0_24 = arith.constant 0 : index
      %42 = vector.load %arg6[%c0_23, %c0_24] : memref<40x128xf32, #tpu.memory_space<vmem>>, vector<32x128xf32>
      tpu.vector_store %arg6[%c0_23, %c0_24], %41 {strides = array<i32>} : memref<40x128xf32, #tpu.memory_space<vmem>>, vector<32x128xf32>,
      %cst_25 = arith.constant 1.000000e+00 : f32
      %43 = vector.broadcast %cst_25 : f32 to vector<8x128xf32>
      %c32 = arith.constant 32 : index
      %c0_26 = arith.constant 0 : index
      %44 = vector.load %arg6[%c32, %c0_26] : memref<40x128xf32, #tpu.memory_space<vmem>>, vector<8x128xf32>
      tpu.vector_store %arg6[%c32, %c0_26], %43 {strides = array<i32>} : memref<40x128xf32, #tpu.memory_space<vmem>>, vector<8x128xf32>,
    } else {
    }
    %c128_i32 = arith.constant 128 : i32
    %3 = arith.muli %arg1, %c128_i32 : i32
    %4 = tpu.assume_multiple %3, 128 : i32
    %c0 = arith.constant 0 : index
    %c0_1 = arith.constant 0 : index
    %5 = arith.index_cast %4 : i32 to index
    %6 = vector.load %arg2[%c0, %c0_1, %5] : memref<1x32x128xf32, #tpu.memory_space<vmem>>, vector<1x32x128xf32>
    %7 = vector.shape_cast %6 : vector<1x32x128xf32> to vector<32x128xf32>
    %c0_2 = arith.constant 0 : index
    %c0_3 = arith.constant 0 : index
    %8 = vector.load %arg3[%c0_2, %c0_3] : memref<32x32xf32, #tpu.memory_space<vmem>>, vector<32x32xf32>
    %cst = arith.constant dense<0.000000e+00> : vector<32x128xf32>
    %9 = tpu.matmul %8, %7, %cst {dimension_numbers = #tpu.dot_dimension_numbers<[1], [0], [0], [1], [0, 0, 1, 1], [], []>} : vector<32x32xf32>, vector<32x128xf32>, vector<32x128xf32> -> vector<32x128xf32>
    %c0_4 = arith.constant 0 : index
    %c0_5 = arith.constant 0 : index
    %c0_6 = arith.constant 0 : index
    %10 = vector.load %arg2[%c0_4, %c0_5, %c0_6] : memref<1x32x128xf32, #tpu.memory_space<vmem>>, vector<1x32x128xf32>
    %11 = vector.shape_cast %10 : vector<1x32x128xf32> to vector<32x128xf32>
    %c0_7 = arith.constant 0 : index
    %c0_8 = arith.constant 0 : index
    %12 = vector.load %arg6[%c0_7, %c0_8] : memref<40x128xf32, #tpu.memory_space<vmem>>, vector<40x128xf32>
    %cst_9 = arith.constant dense<0.000000e+00> : vector<128x128xf32>
    %13 = tpu.matmul %9, %11, %cst_9 {dimension_numbers = #tpu.dot_dimension_numbers<[0], [0], [1], [1], [0, 1, 1, 1], [], []>} : vector<32x128xf32>, vector<32x128xf32>, vector<128x128xf32> -> vector<128x128xf32>
    %14 = tpu.iota {dimensions = array<i32: 1>} : vector<128x128xi32>
    %c64_i32 = arith.constant 64 : i32
    %15 = vector.broadcast %c64_i32 : i32 to vector<128x128xi32>
    %16 = arith.cmpi slt, %14, %15 : vector<128x128xi32>
    %cst_10 = arith.constant -1.000000e+30 : f32
    %17 = vector.broadcast %cst_10 : f32 to vector<128x128xf32>
    %18 = arith.select %16, %13, %17 : vector<128x128xi1>, vector<128x128xf32>
    %cst_11 = arith.constant dense<0xFF800000> : vector<128xf32>
    %19 = vector.multi_reduction <maximumf>, %18, %cst_11 [1] : vector<128x128xf32> to vector<128xf32>
    %20 = vector.shape_cast %19 : vector<128xf32> to vector<128x1xf32>
    %21 = vector.broadcast %20 : vector<128x1xf32> to vector<128x128xf32>
    %22 = arith.subf %18, %21 : vector<128x128xf32>
    %23 = math.exp %22 : vector<128x128xf32>
    %cst_12 = arith.constant dense<0.000000e+00> : vector<40x128xf32>
    %24 = tpu.matmul %12, %23, %cst_12 {dimension_numbers = #tpu.dot_dimension_numbers<[1], [1], [0], [0], [0, 0, 1, 0], [], []>} : vector<40x128xf32>, vector<128x128xf32>, vector<40x128xf32> -> vector<40x128xf32>
    %25 = vector.extract_strided_slice %24 {offsets = [32, 0], sizes = [1, 128], strides = [1, 1]} : vector<40x128xf32> to vector<1x128xf32>
    %26 = tpu.reciprocal %25 {approx = true} : vector<1x128xf32> -> vector<1x128xf32>
    %27 = arith.mulf %25, %26 : vector<1x128xf32>
    %cst_13 = arith.constant 2.000000e+00 : f32
    %28 = vector.broadcast %cst_13 : f32 to vector<1x128xf32>
    %29 = arith.subf %28, %27 : vector<1x128xf32>
    %30 = arith.mulf %26, %29 : vector<1x128xf32>
    %31 = vector.extract_strided_slice %24 {offsets = [0, 0], sizes = [32, 128], strides = [1, 1]} : vector<40x128xf32> to vector<32x128xf32>
    %32 = vector.broadcast %30 : vector<1x128xf32> to vector<32x128xf32>
    %33 = arith.mulf %31, %32 : vector<32x128xf32>
    %34 = arith.addf %33, %7 : vector<32x128xf32>
    %c0_14 = arith.constant 0 : index
    %c0_15 = arith.constant 0 : index
    %c0_16 = arith.constant 0 : index
    %35 = vector.load %arg5[%c0_14, %c0_15, %c0_16] : memref<1x32x128xf32, #tpu.memory_space<vmem>>, vector<1x32x128xf32>
    %36 = vector.shape_cast %35 : vector<1x32x128xf32> to vector<32x128xf32>
    %37 = vector.shape_cast %34 : vector<32x128xf32> to vector<1x32x128xf32>
    tpu.vector_store %arg5[%c0_14, %c0_15, %c0_16], %37 {strides = array<i32>} : memref<1x32x128xf32, #tpu.memory_space<vmem>>, vector<1x32x128xf32>,
    return
  }
  func.func @transform_0(%arg0: i32, %arg1: i32) -> (i32, i32, i32) {
    %c0_i32 = arith.constant 0 : i32
    %c0_i32_0 = arith.constant 0 : i32
    %c0_i32_1 = arith.constant 0 : i32
    return %arg0, %c0_i32, %c0_i32_0 : i32, i32, i32
  }
  func.func @transform_1(%arg0: i32, %arg1: i32) -> (i32, i32) {
    %c0_i32 = arith.constant 0 : i32
    %c0_i32_0 = arith.constant 0 : i32
    %c0_i32_1 = arith.constant 0 : i32
    return %c0_i32, %c0_i32_0 : i32, i32
  }
  func.func @transform_2(%arg0: i32, %arg1: i32) -> (i32, i32) {
    %c0_i32 = arith.constant 0 : i32
    %c0_i32_0 = arith.constant 0 : i32
    %c0_i32_1 = arith.constant 0 : i32
    return %c0_i32, %c0_i32_0 : i32, i32
  }
  func.func @transform_3(%arg0: i32, %arg1: i32) -> (i32, i32, i32) {
    %c0_i32 = arith.constant 0 : i32
    %c0_i32_0 = arith.constant 0 : i32
    return %arg0, %c0_i32, %arg1 : i32, i32, i32
  }
}

</mosaic_0001>

<bundles_post_ra>
// kernel: tpu_custom_call.1
= control target key start
LH: loop header
LB: loop body
LE: loop exit
PB: predicated region body
PF: predicated region fallthrough
CT: control target
= control target key end

     0   :  { %8 = vsyncpa [#allocation4], 0  ;;  %s2002_s0 = inlined_call_operand.hbm [shape: f32[2,32,128], index: 0, kind: input, shape index: {}]   ;;  %s2003_s1 = inlined_call_operand.hbm [shape: f32[32,32], index: 1, kind: input, shape index: {}]   ;;  %s2004_s2 = inlined_call_operand.hbm [shape: f32[32,32], index: 2, kind: input, shape index: {}]   ;;  %s2005_s3 = inlined_call_operand.hbm [shape: f32[2,32,128], index: 3, kind: output, shape index: {}]  }
   0x1   :  { %10 = vsyncpa [#allocation4 + $0x1], 0 }
   0x2   :  { %11 = vsyncpa [#allocation7], 0 }
   0x3   :  { %12 = vsyncpa [#allocation5], 0 }
   0x4   :  { %14 = vsyncpa [#allocation5 + $0x1], 0  ;;  %s1606_s12 = smov 0   ;;  %s1608_s13 = smov 0  }
   0x5   :  { %s1610_s14 = smov 0   ;;  %s1612_s15 = smov 0  }
   0x6   :  { %s1614_s16 = smov 0   ;;  %s1616_s17 = smov 0  }
   0x7 LB: > { %s1018_s18 = sadd.s32 4294967295, %s1572_s17   ;;  %s1019_s19 = sadd.s32 4294967294, %s1572_s17   ;;  %s1572_s17 = sphi %s1616_s17, %s20_s17   ;;  %s1568_s16 = sphi %s1614_s16, %s2027_s16   ;;  %s1564_s15 = sphi %s1612_s15, %s2026_s15   ;;  %s1560_s14 = sphi %s1610_s14, %s2025_s14   ;;  %s1556_s13 = sphi %s1608_s13, %s2024_s13   ;;  %s1552_s12 = sphi %s1606_s12, %s2023_s12  }
   0x8   : > { %p52_p0 = scmp.ne.s32.totalorder %s1556_s13, %s1552_s12  ;;  %p1640_p1 = scmp.eq.s32.totalorder %s1018_s18, 0 }
   0x9   : > { %p1644_p2 = scmp.eq.s32.totalorder %s1018_s18, 1  ;;  %p126_p3 = scmp.eq.s32.totalorder %s1019_s19, 1 }
   0xa   : > { %s2010_s20 = scalar_select %p1640_p1, 1, 0 }
   0xb   : > { %p1650_p4 = por %p1640_p1, %p52_p0  ;;  %p1020_p5 = scmp.ge.s32.totalorder %s1572_s17, 1 }
   0xc   : > { %p1655_p6 = por %p126_p3, %p52_p0  ;;  %p133_p7 = scmp.lt.s32.totalorder %s1572_s17, 3 }
   0xd   : > { %s2012_s22 = scalar_select %p1650_p4, 1, 0 }
   0xe   : > { %s2013_s23 = scalar_select %p1655_p6, 1, 0 }
   0xf   : > { %p1660_p8 = pnand %p1020_p5, %p133_p7  ;;  %s1574_s25 = smov [#allocation6]  }
  0x10   : > { %s145_s26 = sshll.u32 %s1574_s25, 4  ;;  %s1575_s28 = smov [#allocation8]   ;;  %s1664_s26 = int_to_ptr.vmem [resolvable:$true] %s145_s26 }
  0x11   : > { %p1287_p9 = pneg %p1660_p8  ;;  %s158_s29 = sshll.u32 %s1575_s28, 4  ;;  %s1675_s29 = int_to_ptr.vmem [resolvable:$true] %s158_s29 }
  0x12   : > { %s1400_s5 = scalar_lea.hbm %s2003_s1, 512 }
  0x13   : > { %p1671_p11 = pnand %p1287_p9, %p1640_p1  ;;  %p1401_p12 = scmp.ne.s32.totalorder %s2003_s1, %s1400_s5 }
  0x14   : > { %p1407_p5 = scmp.lt.u32.totalorder %s1400_s5, %s2003_s1 }
  0x15   : > { %p1402_p13 = pneg %p1671_p11 }
  0x17   : > { %p1403_p0 = pnand %p1402_p13, %p1401_p12 }
  0x19   : > { %p1404_p3 = pneg %p1403_p0 }
  0x1b   : > { %p1409_p7 = pnand %p1407_p5, %p1404_p3 }
  0x1d   : > { %1412 = shalt.err (!%p1409_p7)
}
  0x1e   : > { %s1413_s10 = scalar_lea.vmem %s1664_s26, 512  ;;  %p1421_p1 = scmp.lt.s32.totalorder %s1664_s26, %s1664_s26 }
  0x1f   : > { %p1414_p9 = scmp.ne.s32.totalorder %s1664_s26, %s1413_s10  ;;  %p1422_p12 = scmp.lt.s32.totalorder %s1413_s10, %s1413_s10 }
  0x21   : > { %p1416_p10 = pnand %p1414_p9, %p1402_p13  ;;  %p1423_p0 = por %p1422_p12, %p1421_p1 }
  0x23   : > { %p1417_p6 = pneg %p1416_p10 }
  0x25   : > { %p1424_p4 = pnand %p1423_p0, %p1417_p6 }
  0x27   : > { %1427 = shalt.err (!%p1424_p4)
}
  0x28   : > { %s1576_s11 = smov 128   ;;  %s1577_s18 = smov 8  }
  0x29   : > { %1290 = dma.hbm_to_vmem [thread:$0]  (!%p1671_p11), %s2003_s1, 512, %s1664_s26, [#allocation7], %s1576_s11, %s1576_s11, %s1577_s18  }
  0x2a   : > { %s1428_s4 = scalar_lea.hbm %s2004_s2, 512 }
  0x2b   : > { %p1429_p1 = scmp.ne.s32.totalorder %s2004_s2, %s1428_s4  ;;  %p1435_p10 = scmp.lt.u32.totalorder %s1428_s4, %s2004_s2 }
  0x2d   : > { %p1431_p4 = pnand %p1429_p1, %p1402_p13 }
  0x2f   : > { %p1432_p6 = pneg %p1431_p4 }
  0x31   : > { %p1437_p3 = pnand %p1435_p10, %p1432_p6 }
  0x33   : > { %1440 = shalt.err (!%p1437_p3)
}
  0x34   : > { %s1441_s26 = scalar_lea.vmem %s1675_s29, 512  ;;  %p1449_p12 = scmp.lt.s32.totalorder %s1675_s29, %s1675_s29 }
  0x35   : > { %p1442_p5 = scmp.ne.s32.totalorder %s1675_s29, %s1441_s26  ;;  %p1450_p0 = scmp.lt.s32.totalorder %s1441_s26, %s1441_s26 }
  0x37   : > { %p1444_p7 = pnand %p1442_p5, %p1402_p13  ;;  %p1451_p1 = por %p1450_p0, %p1449_p12 }
  0x39   : > { %p1445_p9 = pneg %p1444_p7 }
  0x3b   : > { %p1452_p4 = pnand %p1451_p1, %p1445_p9 }
  0x3d   : > { %1455 = shalt.err (!%p1452_p4)
}
  0x3e   : > { %1293 = dma.hbm_to_vmem [thread:$0]  (!%p1671_p11), %s2004_s2, 512, %s1675_s29, [#allocation7], %s1576_s11, %s1576_s11, %s1577_s18  }
  0x3f   : > { %s32_s27 = sadd.s32 1, %s1568_s16  ;;  %s39_s19 = sadd.s32 1, %s1560_s14 }
  0x40   : > { %p34_p13 = scmp.ge.s32.totalorder %s32_s27, 2  ;;  %p46_p6 = scmp.ne.s32.totalorder %s1560_s14, %s1556_s13 }
  0x41   : > { %p47_p10 = scmp.eq.s32.totalorder %s1572_s17, 0  ;;  %p1304_p3 = scmp.lt.s32.totalorder %s1572_s17, 2 }
  0x42   : > { %s2029_s27 = smov (%p34_p13, %s32_s27), 0  ;;  %p1745_p7 = por %p1644_p2, %p46_p6 }
  0x43   : > { %p48_p5 = por %p47_p10, %p46_p6  ;;  %s36_s28 = ssub.s32 %s1568_s16, %s2029_s27 }
  0x44   : > { %s2016_s25 = scalar_select %p1745_p7, 1, 0 }
  0x45   : > { %s172_s30 = sand.u32 1, %s1560_s14   ;;  %p37_p9 = scmp.eq.s32.totalorder %s36_s28, 0 }
  0x46   : > { %s1024_s29 = sshll.u32 %s172_s30, 5  ;;  %s1061_s4 = sshll.u32 %s1568_s16, 9 }
  0x47   : > { %s1754_s5 = scalar_select %p37_p9, %s1560_s14, %s39_s19  }
  0x48   : > { %s1759_s8 = scalar_lea.hbm %s2002_s0, %s1061_s4  ;;  %s176_s21 = scalar_lea.vmem [#allocation3], %s1024_s29 }
  0x49   : > { %s183_s26 = sshll.u32 %s176_s21, 4  ;;  %p1763_p2 = pnand %p1304_p3, %p48_p5  ;;  %s1767_s26 = int_to_ptr.vmem [resolvable:$true] %s183_s26 }
  0x4a   : > { %s1769_s10 = scalar_lea.sflag [#allocation4], %s172_s30  ;;  %s1456_s19 = scalar_lea.hbm %s1759_s8, 512 }
  0x4b   : > { %p1457_p11 = scmp.ne.s32.totalorder %s1759_s8, %s1456_s19  ;;  %p1458_p12 = pneg %p1763_p2 }
  0x4c   : > { %s1461_s4 = scalar_lea.hbm %s2002_s0, 1024  ;;  %p1462_p4 = scmp.lt.u32.totalorder %s1759_s8, %s2002_s0 }
  0x4d   : > { %p1459_p0 = pnand %p1458_p12, %p1457_p11  ;;  %p1463_p13 = scmp.lt.u32.totalorder %s1461_s4, %s1456_s19 }
  0x4e   : > { %p1465_p10 = scmp.lt.u32.totalorder %s1456_s19, %s1759_s8 }
  0x4f   : > { %p1460_p1 = pneg %p1459_p0  ;;  %p1464_p6 = por %p1463_p13, %p1462_p4 }
  0x51   : > { %p1466_p3 = por %p1465_p10, %p1464_p6 }
  0x53   : > { %p1467_p5 = pnand %p1466_p3, %p1460_p1 }
  0x55   : > { %1470 = shalt.err (!%p1467_p5)
}
  0x56   : > { %s1471_s30 = scalar_lea.vmem %s1767_s26, 512  ;;  %s1578_s21 = smov [#allocation3]  }
  0x57   : > { %p1472_p9 = scmp.ne.s32.totalorder %s1767_s26, %s1471_s30  ;;  %s1476_s28 = sshll.u32 %s1578_s21, 4  ;;  %s1477_s28 = int_to_ptr.vmem [resolvable:$false] %s1476_s28 }
  0x58   : > { %s1478_s29 = scalar_lea.vmem %s1477_s28, 1024  ;;  %p1479_p7 = scmp.lt.s32.totalorder %s1767_s26, %s1477_s28 }
  0x59   : > { %p1474_p11 = pnand %p1472_p9, %p1458_p12  ;;  %p1480_p4 = scmp.lt.s32.totalorder %s1478_s29, %s1471_s30 }
  0x5b   : > { %p1475_p0 = pneg %p1474_p11  ;;  %p1481_p13 = por %p1480_p4, %p1479_p7 }
  0x5d   : > { %p1482_p6 = pnand %p1481_p13, %p1475_p0 }
  0x5f   : > { %1485 = shalt.err (!%p1482_p6)
}
  0x60   : > { %1297 = dma.hbm_to_vmem [thread:$0]  (!%p1763_p2), %s1759_s8, 512, %s1767_s26, %s1769_s10, %s1576_s11, %s1576_s11, %s1577_s18  }
  0x61   : > { %195 = sbr.rel (%p1660_p8) target bundleno = 1180 (0x49c), region = 32  ;;  %s1803_s19 = sand.u32 (!%p1660_p8), 1, %s1556_s13  }
  0x62   : > { %s1028_s4 = sshll.u32 (!%p1660_p8), %s1803_s19, 5  ;;  %s198_s6 = scalar_lea.sflag (!%p1660_p8), [#allocation4], %s1803_s19 }
  0x63   : > { %s201_s9 = scalar_lea.vmem (!%p1660_p8), [#allocation3], %s1028_s4  ;;  %p2018_p7 = scmp.ne.s32.totalorder (!%p1660_p8), %s2012_s22, 0 }
  0x68   : > { %1539 = dma.done.wait (%p2018_p7), %s198_s6, 512  }
  0x69   : > { %1541 = vsyncadd (%p2018_p7), %s198_s6, 4294966784  ;;  %p2019_p2 = scmp.ne.s32.totalorder %s2010_s20, 0 }
  0x6b   : > { %1543 = dma.done.wait (%p2019_p2), [#allocation7], 1024  }
  0x6c   : > { %1545 = vsyncadd (%p2019_p2), [#allocation7], 4294966272  ;;  %vm244_vm0 = vcmask 261120   ;;  %v1817_v0 = vld [vmem:[%s201_s9] sm:$0xff]  ;;  %v1819_v1 = vld [vmem:[%s201_s9 + $0x8] sm:$0xff]  ;;  %v691_v38 = vlaneseq  ;;  %v1579_v60 = vmov 0.0|0.0  }
  0x6d   : > { %v1821_v2 = vld [vmem:[%s201_s9 + $0x10] sm:$0xff]  ;;  %v1227_v3 = vpack.c.bf16 %v1819_v1, %v1817_v0  ;;  %v1825_v4 = vld [vmem:[%s201_s9 + $0x18] sm:$0xff]  ;;  %v236_v5 = vld [vmem:[#allocation8] sm:$0xff]  ;;  %1251 = vmatprep.subr.bf16.mxu1 %v1579_v60  ;;  %vm1580_vm2 = vmmov 0   ;;  %s1062_s20 = sshll.u32 %s1564_s15, 9  ;;  %s231_s22 = scalar_lea.vmem [#allocation9], %s1028_s4 }
  0x6e   : > { %v1231_v6 = vpack.c.bf16 %v1825_v4, %v1821_v2  ;;  %1128 = vmatprep.mubr.msk.f32.mxu0 %vm244_vm0, %v236_v5  ;;  %v237_v7 = vld [vmem:[#allocation8 + $0x8] sm:$0xff]  ;;  %v238_v8 = vld [vmem:[#allocation8 + $0x10] sm:$0xff]  ;;  %v239_v9 = vld [vmem:[#allocation8 + $0x18] sm:$0xff]  ;;  %v692_v39 = vand.u32 127, %v691_v38  ;;  %s915_s24 = sshll.u32 %s231_s22, 4  ;;  %s1947_s8 = scalar_lea.hbm %s2005_s3, %s1062_s20  ;;  %s1949_s24 = int_to_ptr.vmem [resolvable:$true] %s915_s24 }
  0x6f   : > { %1228 = vmatprep.subr.bf16.mxu0 %v1227_v3  ;;  %v355_v10 = vld [vmem:[#allocation6] sm:$0xff]  ;;  %v356_v11 = vld [vmem:[#allocation6 + $0x8] sm:$0xff]  ;;  %v357_v12 = vld [vmem:[#allocation6 + $0x10] sm:$0xff]  ;;  %s901_s15 = scalar_lea.sflag [#allocation5], %s1803_s19  ;;  %s1486_s26 = scalar_lea.vmem %s1949_s24, 512 }
  0x70   : > { %1230 = vmatpush3.bf16.msra.mxu0 %v1227_v3  ;;  %v358_v13 = vld [vmem:[#allocation6 + $0x18] sm:$0xff]  ;;  %vm693_vm1 = vcmp.lt.s32.totalorder %v692_v39, 64  ;;  %p1487_p8 = scmp.ne.s32.totalorder %s1949_s24, %s1486_s26  ;;  %p2020_p12 = scmp.ne.s32.totalorder %s2016_s25, 0 }
  0x71   : > { %1232 = vmatprep.subr.bf16.mxu0 %v1231_v6  ;;  %s1583_s10 = smov [#allocation9]  }
  0x72   : > { %p1488_p1 = pnand %p1487_p8, %p2020_p12  ;;  %s1490_s7 = sshll.u32 %s1583_s10, 4  ;;  %s1491_s7 = int_to_ptr.vmem [resolvable:$false] %s1490_s7 }
  0x73   : > { %s1492_s30 = scalar_lea.vmem %s1491_s7, 1024  ;;  %p1493_p3 = scmp.lt.s32.totalorder %s1949_s24, %s1491_s7 }
  0x74   : > { %1234 = vmatpush3.bf16.msra.mxu0 %v1231_v6  ;;  %p1489_p10 = pneg %p1488_p1  ;;  %p1494_p5 = scmp.lt.s32.totalorder %s1492_s30, %s1486_s26 }
  0x75   : > { %1236 = vmatprep.subr.bf16.mxu0 %v1227_v3 }
  0x76   : > { %p1495_p9 = por %p1494_p5, %p1493_p3 }
  0x77   : > { %1129 = vmatmul.mubr.msk.f32.vlgmr.msra.gmra.mrb[0].mxu0 %vm244_vm0, %v237_v7 }
  0x78   : > { %1238 = vmatpush3.bf16.msra.mxu0 %v1227_v3  ;;  %1131 = vmatprep.mubr.msk.f32.mxu0 %vm244_vm0, %v238_v8  ;;  %p1496_p11 = pnand %p1495_p9, %p1489_p10 }
  0x79   : > { %1240 = vmatprep.subr.bf16.mxu0 %v1231_v6 }
  0x7b   : > { %1132 = vmatmul.mubr.msk.f32.gmra.mrb[2].mxu0 %vm244_vm0, %v239_v9 }
  0x7c   : > { %1242 = vmatpush3.bf16.msra.mxu0 %v1231_v6  ;;  %1142 = vmatprep.mubr.msk.f32.mxu0 %vm244_vm0, %v355_v10 }
  0x7d   : > { %1244 = vmatprep.subr.bf16.mxu0 %v1227_v3 }
  0x7f   : > { %1143 = vmatmul.mubr.msk.f32.vlgmr.msra.gmra.mrb[4].mxu0 %vm244_vm0, %v356_v11 }
  0x80   : > { %1145 = vmatprep.mubr.msk.f32.mxu0 %vm244_vm0, %v357_v12  ;;  %1246 = vmatpush3.bf16.msra.mxu0 %v1227_v3 }
  0x81   : > { %1248 = vmatprep.subr.bf16.mxu0 %v1231_v6 }
  0x83   : > { %1146 = vmatmul.mubr.msk.f32.gmra.mrb[6].mxu0 %vm244_vm0, %v358_v13  ;;  %v1581_v13 = vmov 0.0  }
  0x84   : > { %1250 = vmatpush3.bf16.msra.mxu0 %v1231_v6  ;;  %1212 = vmatprep.mubr.msk.f32.mxu1 %vm1580_vm2, %v1581_v13 }
 0x14a   : > { %v1837_v14 = vpop.f32.mrb[0].mxu0 }
 0x14b   : > { %v1839_v15 = vpop.f32.mrb[1].mxu0 }
 0x14e   : > { %v1841_v16 = vpop.f32.mrb[2].mxu0 }
 0x14f   : > { %v1843_v17 = vpop.f32.mrb[3].mxu0 }
 0x152   : > { %v1144_v18 = vpop.f32.mrb[4].mxu0 }
 0x153   : > { %v438_v19 = vpop.f32.mrb[5].mxu0 }
 0x154   : > { %466 = vxpose.xlu0.b32.start [1/4] (short) %v438_v19, 128 }
 0x156   : > { %v1147_v20 = vpop.f32.mrb[6].mxu0 }
 0x157   : > { %v448_v21 = vpop.f32.mrb[7].mxu0 }
 0x158   : > { %467 = vxpose.xlu0.b32.cont [2/4] (short) %v1144_v18, 128 }
 0x15c   : > { %468 = vxpose.xlu0.b32.cont [3/4] (short) %v448_v21, 128 }
 0x160   : > { %469 = vxpose.xlu0.b32.end [4/4] (short) %v1147_v20, 128 }
 0x1d4   : > { %v482_v22 = vpop.trf.xlu0 }
 0x1d5   : > { %1156 = vmatprep.mubr.msk.f32.mxu0 %vm244_vm0, %v482_v22 }
 0x1d8   : > { %v483_v23 = vpop.trf.xlu0 }
 0x1d9   : > { %1157 = vmatmul.mubr.msk.f32.vlgmr.msra.gmra.mrb[8].mxu0 %vm244_vm0, %v483_v23 }
 0x1dc   : > { %v484_v24 = vpop.trf.xlu0 }
 0x1dd   : > { %1159 = vmatprep.mubr.msk.f32.mxu0 %vm244_vm0, %v484_v24 }
 0x1e0   : > { %v485_v25 = vpop.trf.xlu0 }
 0x1e1   : > { %1160 = vmatmul.mubr.msk.f32.gmra.mrb[10].mxu0 %vm244_vm0, %v485_v25 }
 0x1e4   : > { %v486_v26 = vpop.trf.xlu0 }
 0x1e5   : > { %1162 = vmatprep.mubr.msk.f32.mxu0 %vm244_vm0, %v486_v26 }
 0x1e8   : > { %v487_v27 = vpop.trf.xlu0 }
 0x1e9   : > { %1163 = vmatmul.mubr.msk.f32.gmra.mrb[12].mxu0 %vm244_vm0, %v487_v27 }
 0x1ec   : > { %v488_v28 = vpop.trf.xlu0 }
 0x1ed   : > { %1165 = vmatprep.mubr.msk.f32.mxu0 %vm244_vm0, %v488_v28 }
 0x1f0   : > { %v489_v29 = vpop.trf.xlu0 }
 0x1f1   : > { %1166 = vmatmul.mubr.msk.f32.gmra.mrb[14].mxu0 %vm244_vm0, %v489_v29 }
 0x1f4   : > { %v490_v30 = vpop.trf.xlu0 }
 0x1f5   : > { %1168 = vmatprep.mubr.msk.f32.mxu0 %vm244_vm0, %v490_v30 }
 0x1f8   : > { %v491_v31 = vpop.trf.xlu0 }
 0x1f9   : > { %1169 = vmatmul.mubr.msk.f32.gmra.mrb[16].mxu0 %vm244_vm0, %v491_v31 }
 0x1fc   : > { %v492_v32 = vpop.trf.xlu0 }
 0x1fd   : > { %1171 = vmatprep.mubr.msk.f32.mxu0 %vm244_vm0, %v492_v32 }
 0x200   : > { %v493_v33 = vpop.trf.xlu0 }
 0x201   : > { %1172 = vmatmul.mubr.msk.f32.gmra.mrb[18].mxu0 %vm244_vm0, %v493_v33 }
 0x204   : > { %v494_v34 = vpop.trf.xlu0 }
 0x205   : > { %1174 = vmatprep.mubr.msk.f32.mxu0 %vm244_vm0, %v494_v34 }
 0x208   : > { %v495_v35 = vpop.trf.xlu0 }
 0x209   : > { %1175 = vmatmul.mubr.msk.f32.gmra.mrb[20].mxu0 %vm244_vm0, %v495_v35 }
 0x20c   : > { %v496_v36 = vpop.trf.xlu0 }
 0x20d   : > { %1177 = vmatprep.mubr.msk.f32.mxu0 %vm244_vm0, %v496_v36 }
 0x210   : > { %v497_v37 = vpop.trf.xlu0 }
 0x211   : > { %1178 = vmatmul.mubr.msk.f32.gmra.mrb[22].mxu0 %vm244_vm0, %v497_v37 }
 0x2ac   : > { %v1158_v40 = vpop.f32.mrb[8].mxu0 }
 0x2ad   : > { %v612_v41 = vpop.f32.mrb[9].mxu0  ;;  %v695_v42 = vsel %vm693_vm1, %v1158_v40, -1e+30 }
 0x2ae   : > { %712 = vmax.xlane.f32.xlu1 %v695_v42  ;;  %v694_v43 = vsel %vm693_vm1, %v612_v41, -1e+30 }
 0x2b2   : > { %710 = vmax.xlane.f32.xlu1 %v694_v43 }
 0x2b4   : > { %v1161_v44 = vpop.f32.mrb[10].mxu0 }
 0x2b5   : > { %v622_v45 = vpop.f32.mrb[11].mxu0  ;;  %v697_v47 = vsel %vm693_vm1, %v1161_v44, -1e+30 }
 0x2b6   : > { %v696_v46 = vsel %vm693_vm1, %v622_v45, -1e+30 }
 0x2b7   : > { %714 = vmax.xlane.f32.xlu1 %v696_v46 }
 0x2bb   : > { %716 = vmax.xlane.f32.xlu1 %v697_v47 }
 0x2bc   : > { %v1164_v48 = vpop.f32.mrb[12].mxu0 }
 0x2bd   : > { %v632_v49 = vpop.f32.mrb[13].mxu0  ;;  %v699_v50 = vsel %vm693_vm1, %v1164_v48, -1e+30 }
 0x2be   : > { %v698_v51 = vsel %vm693_vm1, %v632_v49, -1e+30 }
 0x2bf   : > { %720 = vmax.xlane.f32.xlu1 %v699_v50  ;;  %718 = vmax.xlane.f32.xlu0 %v698_v51 }
 0x2c4   : > { %v1167_v52 = vpop.f32.mrb[14].mxu0 }
 0x2c5   : > { %v642_v53 = vpop.f32.mrb[15].mxu0  ;;  %v1869_v54 = vsel %vm693_vm1, %v1167_v52, -1e+30 }
 0x2c6   : > { %724 = vmax.xlane.f32.xlu1 %v1869_v54  ;;  %v1873_v55 = vsel %vm693_vm1, %v642_v53, -1e+30 }
 0x2ca   : > { %722 = vmax.xlane.f32.xlu1 %v1873_v55 }
 0x2cc   : > { %v1170_v56 = vpop.f32.mrb[16].mxu0 }
 0x2cd   : > { %v652_v57 = vpop.f32.mrb[17].mxu0  ;;  %v1877_v58 = vsel %vm693_vm1, %v1170_v56, -1e+30 }
 0x2ce   : > { %728 = vmax.xlane.f32.xlu1 %v1877_v58  ;;  %v1881_v59 = vsel %vm693_vm1, %v652_v57, -1e+30 }
 0x2d2   : > { %726 = vmax.xlane.f32.xlu1 %v1881_v59 }
 0x2d4   : > { %v1173_v61 = vpop.f32.mrb[18].mxu0 }
 0x2d5   : > { %v662_v62 = vpop.f32.mrb[19].mxu0  ;;  %v1886_v63 = vsel %vm693_vm1, %v1173_v61, -1e+30 }
 0x2d6   : > { %732 = vmax.xlane.f32.xlu1 %v1886_v63  ;;  %v1890_v3 = vsel %vm693_vm1, %v662_v62, -1e+30 }
 0x2da   : > { %730 = vmax.xlane.f32.xlu1 %v1890_v3 }
 0x2dc   : > { %v1176_v5 = vpop.f32.mrb[20].mxu0 }
 0x2dd   : > { %v672_v6 = vpop.f32.mrb[21].mxu0  ;;  %v1894_v7 = vsel %vm693_vm1, %v1176_v5, -1e+30 }
 0x2de   : > { %736 = vmax.xlane.f32.xlu1 %v1894_v7  ;;  %v1898_v8 = vsel %vm693_vm1, %v672_v6, -1e+30 }
 0x2e2   : > { %734 = vmax.xlane.f32.xlu1 %v1898_v8 }
 0x2e4   : > { %v1179_v9 = vpop.f32.mrb[22].mxu0 }
 0x2e5   : > { %v682_v10 = vpop.f32.mrb[23].mxu0  ;;  %v1906_v12 = vsel %vm693_vm1, %v1179_v9, -1e+30 }
 0x2e6   : > { %v1902_v11 = vsel %vm693_vm1, %v682_v10, -1e+30 }
 0x2e7   : > { %738 = vmax.xlane.f32.xlu1 %v1902_v11 }
 0x2eb   : > { %740 = vmax.xlane.f32.xlu1 %v1906_v12 }
 0x33b   : > { %v713_v18 = vpop.xlane.xlu1 %712 }
 0x33c   : > { %v743_v19 = vsub.f32 %v695_v42, %v713_v18 }
 0x33e   : > { %v760_v20 = vmul.f32 1.442695, %v743_v19 }
 0x33f   : > { %v711_v21 = vpop.xlane.xlu1 %710 }
 0x340   : > { %v742_v22 = vsub.f32 %v694_v43, %v711_v21  ;;  %1366 = vpow2.f32 %v760_v20 }
 0x342   : > { %v758_v23 = vmul.f32 1.442695, %v742_v22 }
 0x344   : > { %1368 = vpow2.f32 %v758_v23  ;;  %v715_v24 = vpop.xlane.xlu1 %714 }
 0x345   : > { %v744_v25 = vsub.f32 %v696_v46, %v715_v24 }
 0x347   : > { %v762_v26 = vmul.f32 1.442695, %v744_v25 }
 0x348   : > { %v717_v27 = vpop.xlane.xlu1 %716 }
 0x349   : > { %v745_v28 = vsub.f32 %v697_v47, %v717_v27  ;;  %1370 = vpow2.f32 %v762_v26 }
 0x34a   : > { %v1367_v32 = vpop.eup %1366 }
 0x34b   : > { %v764_v29 = vmul.f32 1.442695, %v745_v28 }
 0x34c   : > { %v721_v30 = vpop.xlane.xlu1 %720  ;;  %v719_v31 = vpop.xlane.xlu0 %718 }
 0x34d   : > { %1372 = vpow2.f32 %v764_v29  ;;  %v747_v33 = vsub.f32 %v699_v50, %v721_v30  ;;  %v746_v34 = vsub.f32 %v698_v51, %v719_v31 }
 0x34e   : > { %v1369_v35 = vpop.eup %1368 }
 0x34f   : > { %v768_v36 = vmul.f32 1.442695, %v747_v33  ;;  %v766_v37 = vmul.f32 1.442695, %v746_v34  ;;  %v1252_v39 = vpack.c.bf16 %v1367_v32, %v1369_v35 }
 0x351   : > { %1253 = vmatpush3.bf16.xpose.msra.mxu1 %v1252_v39  ;;  %1374 = vpow2.f32 %v768_v36 }
 0x352   : > { %1254 = vmatprep.subr.bf16.mxu1 %v1579_v60  ;;  %1376 = vpow2.f32 %v766_v37 }
 0x353   : > { %v725_v40 = vpop.xlane.xlu1 %724  ;;  %v1371_v42 = vpop.eup %1370 }
 0x354   : > { %v749_v41 = vsub.f32 %v1869_v54, %v725_v40 }
 0x356   : > { %v772_v44 = vmul.f32 1.442695, %v749_v41 }
 0x357   : > { %v1373_v43 = vpop.eup %1372  ;;  %v723_v45 = vpop.xlane.xlu1 %722 }
 0x358   : > { %v748_v46 = vsub.f32 %v1873_v55, %v723_v45  ;;  %v1255_v47 = vpack.c.bf16 %v1373_v43, %v1371_v42  ;;  %1378 = vpow2.f32 %v772_v44 }
 0x35a   : > { %v770_v48 = vmul.f32 1.442695, %v748_v46  ;;  %1256 = vmatpush3.bf16.xpose.msra.mxu1 %v1255_v47 }
 0x35b   : > { %v729_v49 = vpop.xlane.xlu1 %728  ;;  %1257 = vmatprep.subr.bf16.mxu1 %v1579_v60  ;;  %v1375_v50 = vpop.eup %1374 }
 0x35c   : > { %1380 = vpow2.f32 %v770_v48  ;;  %v751_v51 = vsub.f32 %v1877_v58, %v729_v49  ;;  %v1377_v52 = vpop.eup %1376 }
 0x35d   : > { %v1258_v57 = vpack.c.bf16 %v1375_v50, %v1377_v52 }
 0x35e   : > { %v776_v53 = vmul.f32 1.442695, %v751_v51 }
 0x35f   : > { %v727_v54 = vpop.xlane.xlu1 %726 }
 0x360   : > { %v750_v56 = vsub.f32 %v1881_v59, %v727_v54  ;;  %1382 = vpow2.f32 %v776_v53 }
 0x362   : > { %v774_v61 = vmul.f32 1.442695, %v750_v56  ;;  %1259 = vmatpush3.bf16.xpose.msra.mxu1 %v1258_v57  ;;  %v1379_v5 = vpop.eup %1378 }
 0x363   : > { %v733_v55 = vpop.xlane.xlu1 %732  ;;  %1260 = vmatprep.subr.bf16.mxu1 %v1579_v60 }
 0x364   : > { %1384 = vpow2.f32 %v774_v61  ;;  %v753_v62 = vsub.f32 %v1886_v63, %v733_v55 }
 0x366   : > { %v1381_v6 = vpop.eup %1380  ;;  %v780_v9 = vmul.f32 1.442695, %v753_v62 }
 0x367   : > { %v731_v10 = vpop.xlane.xlu1 %730  ;;  %v1261_v58 = vpack.c.bf16 %v1379_v5, %v1381_v6 }
 0x368   : > { %v752_v18 = vsub.f32 %v1890_v3, %v731_v10  ;;  %1386 = vpow2.f32 %v780_v9 }
 0x36a   : > { %v778_v19 = vmul.f32 1.442695, %v752_v18  ;;  %1262 = vmatpush3.bf16.xpose.msra.mxu1 %v1261_v58  ;;  %v1383_v21 = vpop.eup %1382 }
 0x36b   : > { %v737_v59 = vpop.xlane.xlu1 %736  ;;  %1263 = vmatprep.subr.bf16.mxu1 %v1579_v60 }
 0x36c   : > { %1388 = vpow2.f32 %v778_v19  ;;  %v755_v20 = vsub.f32 %v1894_v7, %v737_v59 }
 0x36e   : > { %v1385_v22 = vpop.eup %1384  ;;  %v784_v23 = vmul.f32 1.442695, %v755_v20 }
 0x36f   : > { %v735_v63 = vpop.xlane.xlu1 %734  ;;  %v1264_v24 = vpack.c.bf16 %v1383_v21, %v1385_v22 }
 0x370   : > { %v754_v25 = vsub.f32 %v1898_v8, %v735_v63  ;;  %1390 = vpow2.f32 %v784_v23 }
 0x372   : > { %v782_v26 = vmul.f32 1.442695, %v754_v25  ;;  %1265 = vmatpush3.bf16.xpose.msra.mxu1 %v1264_v24  ;;  %v1387_v27 = vpop.eup %1386 }
 0x373   : > { %1266 = vmatprep.subr.bf16.mxu1 %v1579_v60 }
 0x374   : > { %1392 = vpow2.f32 %v782_v26  ;;  %v739_v3 = vpop.xlane.xlu1 %738 }
 0x375   : > { %v756_v28 = vsub.f32 %v1902_v11, %v739_v3 }
 0x376   : > { %v1389_v29 = vpop.eup %1388 }
 0x377   : > { %v1267_v30 = vpack.c.bf16 %v1387_v27, %v1389_v29  ;;  %v786_v7 = vmul.f32 1.442695, %v756_v28 }
 0x378   : > { %v741_v31 = vpop.xlane.xlu1 %740 }
 0x379   : > { %v757_v32 = vsub.f32 %v1906_v12, %v741_v31  ;;  %1394 = vpow2.f32 %v786_v7 }
 0x37a   : > { %1268 = vmatpush3.bf16.xpose.msra.mxu1 %v1267_v30  ;;  %v1391_v8 = vpop.eup %1390 }
 0x37b   : > { %v788_v33 = vmul.f32 1.442695, %v757_v32  ;;  %1269 = vmatprep.subr.bf16.mxu1 %v1579_v60 }
 0x37d   : > { %1396 = vpow2.f32 %v788_v33 }
 0x37e   : > { %v1393_v34 = vpop.eup %1392 }
 0x37f   : > { %v1270_v35 = vpack.c.bf16 %v1391_v8, %v1393_v34 }
 0x382   : > { %1271 = vmatpush3.bf16.xpose.msra.mxu1 %v1270_v35 }
 0x383   : > { %1272 = vmatprep.subr.bf16.mxu1 %v1579_v60  ;;  %v1395_v36 = vpop.eup %1394  ;;  %v1582_v60 = vmov 1.0  }
 0x387   : > { %v1397_v11 = vpop.eup %1396 }
 0x388   : > { %v1273_v37 = vpack.c.bf16 %v1397_v11, %v1395_v36 }
 0x38a   : > { %1274 = vmatpush3.bf16.xpose.msra.mxu1 %v1273_v37 }
 0x391   : > { %1213 = vmatmul.mubr.f32.vlgmr.msra.gmra.mrb[0].mxu1 %v1839_v15 }
 0x392   : > { %1215 = vmatprep.mubr.msk.f32.mxu1 %vm1580_vm2, %v1581_v13 }
 0x395   : > { %1216 = vmatmul.mubr.f32.gmra.mrb[2].mxu1 %v1837_v14 }
 0x396   : > { %1218 = vmatprep.mubr.msk.f32.mxu1 %vm1580_vm2, %v1581_v13 }
 0x399   : > { %1219 = vmatmul.mubr.f32.gmra.mrb[4].mxu1 %v1843_v17 }
 0x39a   : > { %1221 = vmatprep.mubr.msk.f32.mxu1 %vm1580_vm2, %v1581_v13 }
 0x39d   : > { %1222 = vmatmul.mubr.f32.gmra.mrb[6].mxu1 %v1841_v16  ;;  %v885_v16 = vshrl.u32 %v691_v38, 7 }
 0x39e   : > { %1224 = vmatprep.mubr.msk.f32.mxu1 %vm1580_vm2, %v1581_v13 }
 0x39f   : > { %v886_v47 = vsub.s32 0, %v885_v16 }
 0x3a1   : > { %1225 = vmatmul.mubr.f32.gmra.mrb[8].mxu1 %v1582_v60 }
 0x464   : > { %v856_v15 = vpop.f32.mrb[0].mxu1 }
 0x465   : > { %v1214_v12 = vpop.f32.mrb[1].mxu1 }
 0x468   : > { %v861_v39 = vpop.f32.mrb[2].mxu1 }
 0x469   : > { %v1217_v14 = vpop.f32.mrb[3].mxu1 }
 0x46c   : > { %v866_v40 = vpop.f32.mrb[4].mxu1 }
 0x46d   : > { %v1220_v41 = vpop.f32.mrb[5].mxu1 }
 0x470   : > { %v871_v42 = vpop.f32.mrb[6].mxu1 }
 0x471   : > { %v1223_v17 = vpop.f32.mrb[7].mxu1 }
 0x474   : > { %v876_v43 = vpop.f32.mrb[8].mxu1 }
 0x475   : > { %1398 = vrcp.f32 %v876_v43  ;;  %v1226_v44 = vpop.f32.mrb[9].mxu1 }
 0x47f   : > { %v1399_v45 = vpop.eup %1398 }
 0x480   : > { %v881_v46 = vmul.f32 %v1399_v45, %v876_v43 }
 0x482   : > { %v882_v13 = vsub.f32 2.0, %v881_v46 }
 0x484   : > { %v883_v48 = vmul.f32 %v1399_v45, %v882_v13 }
 0x486   : > { %v887_v49 = vrot.slane %v883_v48, %v886_v47 }
 0x488   : > { %v888_v50 = vmul.f32 %v887_v49, %v856_v15  ;;  %v889_v51 = vmul.f32 %v887_v49, %v861_v39  ;;  %v890_v52 = vmul.f32 %v887_v49, %v866_v40  ;;  %v891_v53 = vmul.f32 %v887_v49, %v871_v42 }
 0x48a   : > { %v892_v38 = vadd.f32 %v888_v50, %v1817_v0  ;;  %v893_v54 = vadd.f32 %v889_v51, %v1819_v1  ;;  %v894_v56 = vadd.f32 %v890_v52, %v1821_v2  ;;  %v895_v57 = vadd.f32 %v891_v53, %v1825_v4 }
 0x48c   : > { %896 = vst [vmem:[%s231_s22] sm:$0xff] %v892_v38  ;;  %897 = vst [vmem:[%s231_s22 + $0x8] sm:$0xff] %v893_v54 }
 0x48d   : > { %898 = vst [vmem:[%s231_s22 + $0x10] sm:$0xff] %v894_v56  ;;  %899 = vst [vmem:[%s231_s22 + $0x18] sm:$0xff] %v895_v57 }
 0x48e   : > { %1499 = shalt.err (!%p1496_p11)
}
 0x48f   : > { %s1500_s21 = scalar_lea.hbm %s1947_s8, 512  ;;  %s1504_s4 = scalar_lea.hbm %s2005_s3, 1024 }
 0x490   : > { %p1501_p0 = scmp.ne.s32.totalorder %s1947_s8, %s1500_s21  ;;  %p1505_p6 = scmp.lt.u32.totalorder %s1947_s8, %s2005_s3 }
 0x491   : > { %p1506_p7 = scmp.lt.u32.totalorder %s1504_s4, %s1500_s21  ;;  %p1508_p8 = scmp.lt.u32.totalorder %s1500_s21, %s1947_s8 }
 0x492   : > { %p1502_p4 = pnand %p1501_p0, %p2020_p12 }
 0x493   : > { %p1507_p2 = por %p1506_p7, %p1505_p6 }
 0x494   : > { %p1503_p13 = pneg %p1502_p4 }
 0x495   : > { %p1509_p1 = por %p1508_p8, %p1507_p2 }
 0x497   : > { %p1510_p10 = pnand %p1509_p1, %p1503_p13 }
 0x499   : > { %1513 = shalt.err (!%p1510_p10)
}
 0x49a   : > { %s1584_s20 = smov 128   ;;  %s1585_s22 = smov 8  }
 0x49b   : > { %1285 = dma.vmem_to_hbm [thread:$0]  (%p2020_p12), %s1949_s24, 512, %s1947_s8, %s901_s15, %s1584_s20, %s1584_s20, %s1585_s22  }
 0x49c PF: > { %s930_s11 = sand.u32 1, %s1552_s12   ;;  %p2021_p3 = scmp.ne.s32.totalorder %s2013_s23, 0 }
 0x49d   : > { %p2022_p5 = scmp.ge.s32.totalorder %s1572_s17, 2  ;;  %s931_s18 = scalar_lea.sflag [#allocation5], %s930_s11 }
 0x49f   : > { %p1299_p9 = pnand %p2022_p5, %p2021_p3 }
 0x4a1   : > { %1547 = dma.done.wait (!%p1299_p9), %s931_s18, 512  }
 0x4a2   : > { %1549 = vsyncadd (!%p1299_p9), %s931_s18, 4294966784  ;;  %s20_s17 = sadd.s32 1, %s1572_s17   ;;  %s2023_s12 = smov %s1556_s13 }
 0x4a3   : > { %p17_p11 = scmp.ge.s32.totalorder %s20_s17, 4   ;;  %s2024_s13 = smov %s1560_s14 }
 0x4a4   : > { %s2025_s14 = smov %s1754_s5  ;;  %s2026_s15 = smov %s1568_s16 }
 0x4a5   : > { %s2027_s16 = smov %s2029_s27  ;;  %19 = sbr.rel (!%p17_p11) target bundleno = 7 (0x7), region = 90 }
 0x4ac   :  { %936 = vsyncpa [#allocation4], 1 }
 0x4ad   :  { %938 = vsyncpa [#allocation4 + $0x1], 1 }
 0x4ae   :  { %939 = vsyncpa [#allocation7], 1 }
 0x4af   :  { %940 = vsyncpa [#allocation5], 1 }
 0x4b0   :  { %942 = vsyncpa [#allocation5 + $0x1], 1 }

</bundles_post_ra>
